<compile_context>
chip_gen: v6e
topology: v6e:2x2x1
jax: 0.10.0
libtpu: 0.0.40
codegen_flags: <defaults>
</compile_context>

<pallas_src>
import functools

import jax
import jax.numpy as jnp
from jax.experimental import pallas as pl
from jax.experimental.pallas import tpu as pltpu

_LANE = 128
_SUBLANE_BF16 = 16  # bf16 sublane packing granularity


def _round_up(n: int, m: int) -> int:
    return ((n + m - 1) // m) * m


def _cores_per_chip() -> int:
    """TensorCores per chip: 1 on v5e/v6e (lite), 2 on v7x and megacore v4/v5p."""
    try:
        kind = jax.devices()[0].device_kind.lower()
    except Exception:
        return 1
    if "lite" in kind or "v5e" in kind or "v6e" in kind:
        return 1
    if "v7" in kind or "v4" in kind or "v5p" in kind:
        return 2
    return 1


def _choose_block_rows(batch: int, num_cores: int, *, cap: int = 512) -> int:
    """Row tile: one grid step on single-TC chips, a num_cores-way 'parallel' split
    otherwise. Capped so x/out tiles stay tiny in VMEM (re-derive the cap against
    v7x's 64 MiB VMEM if this MLP is ever scaled up)."""
    per_core = pl.cdiv(batch, max(num_cores, 1))
    rows = _round_up(max(per_core, _SUBLANE_BF16), _SUBLANE_BF16)
    return min(rows, cap)


def _mlp_kernel(x_ref, w1_ref, b1_ref, w2_ref, b2_ref, w3_ref, b3_ref, o_ref):
    # fc1: bf16 operands on the MXU (K=32, single pass), f32 accumulation; bias+ReLU in f32.
    h1 = jnp.dot(x_ref[...], w1_ref[...], preferred_element_type=jnp.float32)
    h1 = jnp.maximum(h1 + b1_ref[...], 0.0)
    # dropout(p=0.5) == identity in eval mode
    # fc2 + ReLU (K=64, single MXU pass)
    h2 = jnp.dot(h1.astype(w2_ref.dtype), w2_ref[...], preferred_element_type=jnp.float32)
    h2 = jnp.maximum(h2 + b2_ref[...], 0.0)
    # dropout == identity; fc3 (logits), output lanes padded to 128 -> lane-dense store
    out = jnp.dot(h2.astype(w3_ref.dtype), w3_ref[...], preferred_element_type=jnp.float32)
    o_ref[...] = (out + b3_ref[...]).astype(o_ref.dtype)


def prepare_params(w1, b1, w2, b2, w3, b3, compute_dtype=jnp.bfloat16):
    """One-time parameter prep (call once, reuse across forward calls):
    cast weights to bf16 for the MXU, keep biases f32 for the VPU epilogue,
    and zero-pad ONLY the fc3 output lane dim to a multiple of 128."""
    H = w1.shape[1]
    O = w3.shape[1]
    Op = _round_up(O, _LANE)

    w1c = w1.astype(compute_dtype)
    w2c = w2.astype(compute_dtype)
    w3p = jnp.zeros((H, Op), compute_dtype).at[:, :O].set(w3.astype(compute_dtype))

    b1c = b1.astype(jnp.float32).reshape(1, -1)
    b2c = b2.astype(jnp.float32).reshape(1, -1)
    b3p = jnp.zeros((1, Op), jnp.float32).at[:, :O].set(
        b3.astype(jnp.float32).reshape(1, -1))
    return (w1c, b1c, w2c, b2c, w3p, b3p)


@functools.partial(jax.jit, static_argnames=("out_features", "block_rows", "out_dtype"))
def mlp_forward(x, w1, b1, w2, b2, w3p, b3p, *, out_features, block_rows,
                out_dtype=jnp.float32):
    """Fused 3-layer MLP forward. x: (B, in_features); params from prepare_params()."""
    B, F = x.shape
    H = w1.shape[1]
    Op = w3p.shape[1]
    compute_dtype = w1.dtype

    Bp = _round_up(B, block_rows)
    grid = (Bp // block_rows,)

    xc = x.astype(compute_dtype)
    if Bp != B:  # static at trace time; fused into the jitted executable
        xc = jnp.zeros((Bp, F), compute_dtype).at[:B].set(xc)

    itemsize = jnp.dtype(compute_dtype).itemsize
    cost = pl.CostEstimate(
        flops=2 * Bp * (F * H + H * H + H * Op),
        transcendentals=0,
        bytes_accessed=(Bp * F + F * H + H * H + H * Op) * itemsize
                       + (H + H + Op) * 4
                       + Bp * Op * jnp.dtype(out_dtype).itemsize,
    )

    out_padded = pl.pallas_call(
        _mlp_kernel,
        out_shape=jax.ShapeDtypeStruct((Bp, Op), out_dtype),
        grid_spec=pltpu.PrefetchScalarGridSpec(
            num_scalar_prefetch=0,
            grid=grid,
            in_specs=[
                pl.BlockSpec((block_rows, F), lambda i: (i, 0)),  # x row tile (unpadded K)
                pl.BlockSpec((F, H), lambda i: (0, 0)),           # w1 (full, resident)
                pl.BlockSpec((1, H), lambda i: (0, 0)),           # b1
                pl.BlockSpec((H, H), lambda i: (0, 0)),           # w2
                pl.BlockSpec((1, H), lambda i: (0, 0)),           # b2
                pl.BlockSpec((H, Op), lambda i: (0, 0)),          # w3 (lane-padded)
                pl.BlockSpec((1, Op), lambda i: (0, 0)),          # b3
            ],
            out_specs=pl.BlockSpec((block_rows, Op), lambda i: (i, 0)),
        ),
        compiler_params=pltpu.CompilerParams(
            dimension_semantics=("parallel",),   # shards row tiles across TCs on v7x/megacore
            vmem_limit_bytes=32 * 1024 * 1024,   # << footprint today; fits v7x's 64 MiB physical
        ),
        cost_estimate=cost,
    )(xc, w1, b1, w2, b2, w3p, b3p)

    # Slice off padded batch rows and padded output lanes (fused into the same executable).
    return out_padded[:B, :out_features]


def init_params(key, in_features, intermediate_features, output_size, dtype=jnp.float32):
    """Deterministic synthetic parameters (uniform init ~ PyTorch Linear default scale)."""
    ks = jax.random.split(key, 6)

    def lin(kw, kb, fan_in, fan_out):
        bound = 1.0 / jnp.sqrt(fan_in)
        w = jax.random.uniform(kw, (fan_in, fan_out), dtype, -bound, bound)
        b = jax.random.uniform(kb, (1, fan_out), dtype, -bound, bound)
        return w, b

    w1, b1 = lin(ks[0], ks[1], in_features, intermediate_features)
    w2, b2 = lin(ks[2], ks[3], intermediate_features, intermediate_features)
    w3, b3 = lin(ks[4], ks[5], intermediate_features, output_size)
    return w1, b1, w2, b2, w3, b3


if __name__ == "__main__":
    # Module config: MLP(in_features=32, intermediate_features=64,
    #                   methods=["a","b","c"], multiclass=True) -> output_size=3
    # (extract_features=False default: full fc1->fc2->fc3 path.)
    in_features = 32
    intermediate_features = 64
    methods = ["a", "b", "c"]
    output_size = len(methods)  # multiclass=True
    batch = 16                  # small; bf16-sublane aligned so no batch padding needed

    key = jax.random.PRNGKey(0)
    kx, kp = jax.random.split(key)
    x = jax.random.normal(kx, (batch, in_features), jnp.float32)
    raw_params = init_params(kp, in_features, intermediate_features, output_size)

    # One-time prep (cache these; not on the per-call path).
    params = prepare_params(*raw_params)
    block_rows = _choose_block_rows(batch, _cores_per_chip())

    out = mlp_forward(x, *params, out_features=output_size, block_rows=block_rows)
    out = jax.block_until_ready(out)
    assert out.shape == (batch, output_size)

    # Pure-JAX reference with the same bf16-operand / f32-accumulate recipe
    # (dropout = identity in eval mode).
    w1, b1, w2, b2, w3, b3 = raw_params
    bf = jnp.bfloat16
    ref = jnp.maximum(
        jnp.dot(x.astype(bf), w1.astype(bf), preferred_element_type=jnp.float32) + b1, 0.0)
    ref = jnp.maximum(
        jnp.dot(ref.astype(bf), w2.astype(bf), preferred_element_type=jnp.float32) + b2, 0.0)
    ref = jnp.dot(ref.astype(bf), w3.astype(bf), preferred_element_type=jnp.float32) + b3
    assert jnp.allclose(out, ref, atol=1e-3, rtol=1e-3), float(jnp.max(jnp.abs(out - ref)))

    # Sanity vs. full-f32 math (bf16 rounding only).
    ref32 = jnp.maximum(x @ w1 + b1, 0.0)
    ref32 = jnp.maximum(ref32 @ w2 + b2, 0.0)
    ref32 = ref32 @ w3 + b3
    assert jnp.allclose(out, ref32, atol=5e-2, rtol=5e-2)

    print("KERNEL_OK")
</pallas_src>

<mosaic_0001>
module attributes {stable_mosaic.version = 11 : i64} {
  func.func @_mlp_kernel(%arg0: i32, %arg1: memref<16x32xbf16, #tpu.memory_space<vmem>>, %arg2: memref<32x64xbf16, #tpu.memory_space<vmem>>, %arg3: memref<1x64xf32, #tpu.memory_space<vmem>>, %arg4: memref<64x64xbf16, #tpu.memory_space<vmem>>, %arg5: memref<1x64xf32, #tpu.memory_space<vmem>>, %arg6: memref<64x128xbf16, #tpu.memory_space<vmem>>, %arg7: memref<1x128xf32, #tpu.memory_space<vmem>>, %arg8: memref<16x128xf32, #tpu.memory_space<vmem>>) attributes {dimension_semantics = [#tpu.dimension_semantics<parallel>], iteration_bounds = array<i64: 1>, scalar_prefetch = 0 : i64, scratch_operands = 0 : i64, tpu.core_type = #tpu.core_type<tc>, window_params = [{transform_indices = @transform_0, window_bounds = array<i64: 16, 32>}, {pipeline_mode = #tpu.pipeline_mode<synchronous>, transform_indices = @transform_1, window_bounds = array<i64: 32, 64>}, {pipeline_mode = #tpu.pipeline_mode<synchronous>, transform_indices = @transform_2, window_bounds = array<i64: 1, 64>}, {pipeline_mode = #tpu.pipeline_mode<synchronous>, transform_indices = @transform_3, window_bounds = array<i64: 64, 64>}, {pipeline_mode = #tpu.pipeline_mode<synchronous>, transform_indices = @transform_4, window_bounds = array<i64: 1, 64>}, {pipeline_mode = #tpu.pipeline_mode<synchronous>, transform_indices = @transform_5, window_bounds = array<i64: 64, 128>}, {pipeline_mode = #tpu.pipeline_mode<synchronous>, transform_indices = @transform_6, window_bounds = array<i64: 1, 128>}, {transform_indices = @transform_7, window_bounds = array<i64: 16, 128>}]} {
    %c0 = arith.constant 0 : index
    %c0_0 = arith.constant 0 : index
    %0 = vector.load %arg1[%c0, %c0_0] : memref<16x32xbf16, #tpu.memory_space<vmem>>, vector<16x32xbf16>
    %c0_1 = arith.constant 0 : index
    %c0_2 = arith.constant 0 : index
    %1 = vector.load %arg2[%c0_1, %c0_2] : memref<32x64xbf16, #tpu.memory_space<vmem>>, vector<32x64xbf16>
    %cst = arith.constant dense<0.000000e+00> : vector<16x64xf32>
    %2 = tpu.matmul %0, %1, %cst {dimension_numbers = #tpu.dot_dimension_numbers<[1], [0], [0], [1], [0, 0, 1, 1], [], []>} : vector<16x32xbf16>, vector<32x64xbf16>, vector<16x64xf32> -> vector<16x64xf32>
    %c0_3 = arith.constant 0 : index
    %c0_4 = arith.constant 0 : index
    %3 = vector.load %arg3[%c0_3, %c0_4] : memref<1x64xf32, #tpu.memory_space<vmem>>, vector<1x64xf32>
    %4 = vector.broadcast %3 : vector<1x64xf32> to vector<16x64xf32>
    %5 = arith.addf %2, %4 : vector<16x64xf32>
    %cst_5 = arith.constant 0.000000e+00 : f32
    %6 = vector.broadcast %cst_5 : f32 to vector<16x64xf32>
    %7 = arith.maximumf %5, %6 : vector<16x64xf32>
    %8 = arith.truncf %7 : vector<16x64xf32> to vector<16x64xbf16>
    %c0_6 = arith.constant 0 : index
    %c0_7 = arith.constant 0 : index
    %9 = vector.load %arg4[%c0_6, %c0_7] : memref<64x64xbf16, #tpu.memory_space<vmem>>, vector<64x64xbf16>
    %cst_8 = arith.constant dense<0.000000e+00> : vector<16x64xf32>
    %10 = tpu.matmul %8, %9, %cst_8 {dimension_numbers = #tpu.dot_dimension_numbers<[1], [0], [0], [1], [0, 0, 1, 1], [], []>} : vector<16x64xbf16>, vector<64x64xbf16>, vector<16x64xf32> -> vector<16x64xf32>
    %c0_9 = arith.constant 0 : index
    %c0_10 = arith.constant 0 : index
    %11 = vector.load %arg5[%c0_9, %c0_10] : memref<1x64xf32, #tpu.memory_space<vmem>>, vector<1x64xf32>
    %12 = vector.broadcast %11 : vector<1x64xf32> to vector<16x64xf32>
    %13 = arith.addf %10, %12 : vector<16x64xf32>
    %cst_11 = arith.constant 0.000000e+00 : f32
    %14 = vector.broadcast %cst_11 : f32 to vector<16x64xf32>
    %15 = arith.maximumf %13, %14 : vector<16x64xf32>
    %16 = arith.truncf %15 : vector<16x64xf32> to vector<16x64xbf16>
    %c0_12 = arith.constant 0 : index
    %c0_13 = arith.constant 0 : index
    %17 = vector.load %arg6[%c0_12, %c0_13] : memref<64x128xbf16, #tpu.memory_space<vmem>>, vector<64x128xbf16>
    %cst_14 = arith.constant dense<0.000000e+00> : vector<16x128xf32>
    %18 = tpu.matmul %16, %17, %cst_14 {dimension_numbers = #tpu.dot_dimension_numbers<[1], [0], [0], [1], [0, 0, 1, 1], [], []>} : vector<16x64xbf16>, vector<64x128xbf16>, vector<16x128xf32> -> vector<16x128xf32>
    %c0_15 = arith.constant 0 : index
    %c0_16 = arith.constant 0 : index
    %19 = vector.load %arg7[%c0_15, %c0_16] : memref<1x128xf32, #tpu.memory_space<vmem>>, vector<1x128xf32>
    %20 = vector.broadcast %19 : vector<1x128xf32> to vector<16x128xf32>
    %21 = arith.addf %18, %20 : vector<16x128xf32>
    %c0_17 = arith.constant 0 : index
    %c0_18 = arith.constant 0 : index
    %22 = vector.load %arg8[%c0_17, %c0_18] : memref<16x128xf32, #tpu.memory_space<vmem>>, vector<16x128xf32>
    tpu.vector_store %arg8[%c0_17, %c0_18], %21 {strides = array<i32>} : memref<16x128xf32, #tpu.memory_space<vmem>>, vector<16x128xf32>,
    return
  }
  func.func @transform_0(%arg0: i32) -> (i32, i32) {
    %c0_i32 = arith.constant 0 : i32
    %c0_i32_0 = arith.constant 0 : i32
    return %arg0, %c0_i32 : i32, i32
  }
  func.func @transform_1(%arg0: i32) -> (i32, i32) {
    %c0_i32 = arith.constant 0 : i32
    %c0_i32_0 = arith.constant 0 : i32
    %c0_i32_1 = arith.constant 0 : i32
    return %c0_i32, %c0_i32_0 : i32, i32
  }
  func.func @transform_2(%arg0: i32) -> (i32, i32) {
    %c0_i32 = arith.constant 0 : i32
    %c0_i32_0 = arith.constant 0 : i32
    %c0_i32_1 = arith.constant 0 : i32
    return %c0_i32, %c0_i32_0 : i32, i32
  }
  func.func @transform_3(%arg0: i32) -> (i32, i32) {
    %c0_i32 = arith.constant 0 : i32
    %c0_i32_0 = arith.constant 0 : i32
    %c0_i32_1 = arith.constant 0 : i32
    return %c0_i32, %c0_i32_0 : i32, i32
  }
  func.func @transform_4(%arg0: i32) -> (i32, i32) {
    %c0_i32 = arith.constant 0 : i32
    %c0_i32_0 = arith.constant 0 : i32
    %c0_i32_1 = arith.constant 0 : i32
    return %c0_i32, %c0_i32_0 : i32, i32
  }
  func.func @transform_5(%arg0: i32) -> (i32, i32) {
    %c0_i32 = arith.constant 0 : i32
    %c0_i32_0 = arith.constant 0 : i32
    %c0_i32_1 = arith.constant 0 : i32
    return %c0_i32, %c0_i32_0 : i32, i32
  }
  func.func @transform_6(%arg0: i32) -> (i32, i32) {
    %c0_i32 = arith.constant 0 : i32
    %c0_i32_0 = arith.constant 0 : i32
    %c0_i32_1 = arith.constant 0 : i32
    return %c0_i32, %c0_i32_0 : i32, i32
  }
  func.func @transform_7(%arg0: i32) -> (i32, i32) {
    %c0_i32 = arith.constant 0 : i32
    %c0_i32_0 = arith.constant 0 : i32
    return %arg0, %c0_i32 : i32, i32
  }
}

</mosaic_0001>

<bundles_post_ra>
// kernel: mlp_forward.1
= control target key start
LH: loop header
LB: loop body
LE: loop exit
PB: predicated region body
PF: predicated region fallthrough
CT: control target
= control target key end

     0   :  { %12 = vsyncpa [#allocation3], 0  ;;  %s554_s0 = inlined_call_operand.vmem [shape: bf16[16,32], index: 0, kind: input, shape index: {}]   ;;  %s555_s1 = inlined_call_operand.hbm [shape: bf16[32,64], index: 1, kind: input, shape index: {}]   ;;  %s556_s2 = inlined_call_operand.vmem [shape: f32[1,64], index: 2, kind: input, shape index: {}]   ;;  %s557_s3 = inlined_call_operand.hbm [shape: bf16[64,64], index: 3, kind: input, shape index: {}]   ;;  %s558_s4 = inlined_call_operand.hbm [shape: f32[1,64], index: 4, kind: input, shape index: {}]   ;;  %s559_s5 = inlined_call_operand.vmem [shape: bf16[64,128], index: 5, kind: input, shape index: {}]   ;;  %s560_s6 = inlined_call_operand.vmem [shape: f32[1,128], index: 6, kind: input, shape index: {}]   ;;  %s561_s7 = inlined_call_operand.vmem [shape: f32[16,128], index: 7, kind: output, shape index: {}]  }
   0x1   :  { %13 = vsyncpa [#allocation5], 0  ;;  %s466_s24 = smov [#allocation4]   ;;  %s467_s26 = smov [#allocation2]  }
   0x2   :  { %s35_s25 = sshll.u32 %s466_s24, 4  ;;  %s21_s27 = sshll.u32 %s467_s26, 4  ;;  %s36_s25 = int_to_ptr.vmem [resolvable:$true] %s35_s25  ;;  %s22_s27 = int_to_ptr.vmem [resolvable:$true] %s21_s27 }
   0x3   :  { %s410_s28 = scalar_lea.vmem %s36_s25, 512  ;;  %p415_p1 = scmp.lt.s32.totalorder %s36_s25, %s36_s25 }
   0x4   :  { %p411_p0 = scmp.ne.s32.totalorder %s36_s25, %s410_s28  ;;  %p416_p2 = scmp.lt.s32.totalorder %s410_s28, %s410_s28 }
   0x6   :  { %p417_p3 = por %p416_p2, %p415_p1 }
   0x8   :  { %p418_p4 = pnand %p417_p3, %p411_p0 }
   0xa   :  { %421 = shalt.err (!%p418_p4)
}
   0xb   :  { %s468_s29 = smov 64   ;;  %s469_s30 = smov 4  }
   0xc   :  { %41 = dma.hbm_to_vmem [thread:$0]  %s557_s3, 512, %s36_s25, [#allocation5], %s468_s29, %s468_s29, %s469_s30  }
   0xd   :  { %s430_s10 = scalar_lea.vmem %s22_s27, 256  ;;  %p435_p6 = scmp.lt.s32.totalorder %s22_s27, %s22_s27 }
   0xe   :  { %p431_p5 = scmp.ne.s32.totalorder %s22_s27, %s430_s10  ;;  %p436_p7 = scmp.lt.s32.totalorder %s430_s10, %s430_s10 }
  0x10   :  { %p437_p8 = por %p436_p7, %p435_p6 }
  0x12   :  { %p438_p9 = pnand %p437_p8, %p431_p5 }
  0x14   :  { %441 = shalt.err (!%p438_p9)
}
  0x15   :  { %27 = dma.hbm_to_vmem [thread:$0]  %s555_s1, 256, %s22_s27, [#allocation3], %s468_s29, %s468_s29, %s469_s30  }
  0x16   :  { %s470_s13 = smov [#allocation6]  }
  0x17   :  { %s48_s14 = sshll.u32 %s470_s13, 4  ;;  %s49_s14 = int_to_ptr.vmem [resolvable:$true] %s48_s14 }
  0x18   :  { %s450_s15 = scalar_lea.vmem %s49_s14, 16  ;;  %s454_s16 = scalar_lea.vmem %s49_s14, 32 }
  0x19   :  { %p451_p10 = scmp.ne.s32.totalorder %s49_s14, %s450_s15  ;;  %p455_p11 = scmp.lt.s32.totalorder %s49_s14, %s49_s14 }
  0x1a   :  { %p456_p12 = scmp.lt.s32.totalorder %s454_s16, %s450_s15 }
  0x1c   :  { %p457_p13 = por %p456_p12, %p455_p11 }
  0x1e   :  { %p458_p0 = pnand %p457_p13, %p451_p10 }
  0x20   :  { %461 = shalt.err (!%p458_p0)
}
  0x21   :  { %51 = dma.hbm_to_vmem [thread:$0]  %s558_s4, 16, %s49_s14, [#allocation5]  }
  0x22   :  { %462 = dma.done.wait [#allocation3], 256  }
  0x23   :  { %463 = vsyncadd [#allocation3], 4294967040 }
  0x24   :  { %464 = dma.done.wait [#allocation5], 528  }
  0x25   :  { %465 = vsyncadd [#allocation5], 4294966768  ;;  %v471_v0 = vmov 0.0   ;;  %vm472_vm0 = vmmov 0   ;;  %v391_v1 = vld [vmem:[#allocation2 + $0x8] sm:$0xff]   ;;  %v392_v2 = vld [vmem:[#allocation2] sm:$0xff]  }
  0x26   :  { %352 = vmatprep.subr.bf16.mxu0 %v471_v0  ;;  %356 = vmatprep.mubr.msk.bf16.mxu0 %vm472_vm0, %v471_v0  ;;  %v394_v3 = vld [vmem:[#allocation4 + $0x18] sm:$0xff]   ;;  %v393_v4 = vld [vmem:[%s554_s0] sm:$0xff]   ;;  %vm96_vm1 = vcmask 261120   ;;  %v396_v6 = vld [vmem:[#allocation4 + $0x8] sm:$0xff]   ;;  %vm183_vm2 = vcmask 523264  }
  0x27   :  { %360 = vmatprep.subr.bf16.mxu1 %v471_v0  ;;  %368 = vmatprep.mubr.msk.bf16.mxu1 %vm472_vm0, %v471_v0  ;;  %v395_v5 = vld [vmem:[#allocation4 + $0x10] sm:$0xff]   ;;  %v397_v7 = vld [vmem:[#allocation4] sm:$0xff]   ;;  %v398_v8 = vld [vmem:[%s559_s5 + $0x18] sm:$0xff]  }
  0x28   :  { %353 = vmatpush3.bf16.msra.mxu0 %v391_v1  ;;  %361 = vmatpush3.bf16.msra.mxu1 %v394_v3  ;;  %v322_v9 = vld [vmem:[%s556_s2] ss:$0 sm:$0xff]  ;;  %v399_v19 = vld [vmem:[%s559_s5 + $0x10] sm:$0xff]   ;;  %v400_v20 = vld [vmem:[%s559_s5 + $0x8] sm:$0xff]  }
  0x29   :  { %354 = vmatprep.subr.bf16.mxu0 %v471_v0  ;;  %362 = vmatprep.subr.bf16.mxu1 %v471_v0  ;;  %v401_v21 = vld [vmem:[%s559_s5] sm:$0xff]   ;;  %v327_v22 = vld [vmem:[#allocation6] ss:$0 sm:$0xff] }
  0x2a   :  { %v333_v32 = vld [vmem:[%s560_s6] ss:$0 sm:$0xff] }
  0x2c   :  { %355 = vmatpush3.bf16.msra.mxu0 %v392_v2  ;;  %363 = vmatpush3.bf16.msra.mxu1 %v395_v5 }
  0x2d   :  { %372 = vmatprep.subr.bf16.mxu0 %v471_v0  ;;  %364 = vmatprep.subr.bf16.mxu1 %v471_v0 }
  0x2f   :  { %357 = vmatmul.mubr.msk.bf16.vlgmr.msra.gmra.mxu0 %vm96_vm1, %v393_v4 }
  0x30   :  { %380 = vmatprep.mubr.msk.bf16.mxu0 %vm472_vm0, %v471_v0  ;;  %365 = vmatpush3.bf16.msra.mxu1 %v396_v6 }
  0x31   :  { %366 = vmatprep.subr.bf16.mxu1 %v471_v0  ;;  %373 = vmatpush3.bf16.msra.mxu0 %v398_v8 }
  0x32   :  { %374 = vmatprep.subr.bf16.mxu0 %v471_v0 }
  0x34   :  { %367 = vmatpush3.bf16.msra.mxu1 %v397_v7 }
  0x35   :  { %375 = vmatpush3.bf16.msra.mxu0 %v399_v19 }
  0x36   :  { %376 = vmatprep.subr.bf16.mxu0 %v471_v0 }
  0x39   :  { %377 = vmatpush3.bf16.msra.mxu0 %v400_v20 }
  0x3a   :  { %378 = vmatprep.subr.bf16.mxu0 %v471_v0 }
  0x3d   :  { %379 = vmatpush3.bf16.msra.mxu0 %v401_v21 }
  0xef   :  { %v134_v10 = vpop.f32.mrf.mxu0 }
  0xf0   :  { %v135_v12 = vadd.f32 %v322_v9, %v134_v10 }
  0xf1   :  { %v358_v11 = vpop.f32.mrf.mxu0 }
  0xf2   :  { %v141_v16 = vmax.f32 %v135_v12, 0.0 }
  0xf3   :  { %v137_v13 = vpop.f32.mrf.mxu0 }
  0xf4   :  { %v138_v14 = vadd.f32 %v322_v9, %v137_v13 }
  0xf5   :  { %v359_v15 = vpop.f32.mrf.mxu0 }
  0xf6   :  { %v142_v17 = vmax.f32 %v138_v14, 0.0 }
  0xf8   :  { %v143_v18 = vpack.c.bf16 %v142_v17, %v141_v16 }
  0xfa   :  { %369 = vmatmul.mubr.msk.bf16.vlgmr.msra.gmra.mxu1 %vm183_vm2, %v143_v18 }
 0x1ba   :  { %v221_v23 = vpop.f32.mrf.mxu1 }
 0x1bb   :  { %v222_v25 = vadd.f32 %v327_v22, %v221_v23 }
 0x1bc   :  { %v370_v24 = vpop.f32.mrf.mxu1 }
 0x1bd   :  { %v228_v29 = vmax.f32 %v222_v25, 0.0 }
 0x1be   :  { %v224_v26 = vpop.f32.mrf.mxu1 }
 0x1bf   :  { %v225_v27 = vadd.f32 %v327_v22, %v224_v26 }
 0x1c0   :  { %v371_v28 = vpop.f32.mrf.mxu1 }
 0x1c1   :  { %v229_v30 = vmax.f32 %v225_v27, 0.0 }
 0x1c3   :  { %v230_v31 = vpack.c.bf16 %v229_v30, %v228_v29 }
 0x1c5   :  { %381 = vmatmul.mubr.msk.bf16.vlgmr.msra.gmra.mxu0 %vm183_vm2, %v230_v31 }
 0x285   :  { %v307_v33 = vpop.f32.mrf.mxu0 }
 0x286   :  { %v308_v34 = vadd.f32 %v333_v32, %v307_v33 }
 0x287   :  { %v382_v35 = vpop.f32.mrf.mxu0 }
 0x288   :  { %314 = vst [vmem:[%s561_s7] sm:$0xff] %v308_v34 }
 0x289   :  { %v310_v36 = vpop.f32.mrf.mxu0 }
 0x28a   :  { %v311_v37 = vadd.f32 %v333_v32, %v310_v36 }
 0x28b   :  { %v383_v38 = vpop.f32.mrf.mxu0 }
 0x28c   :  { %315 = vst [vmem:[%s561_s7 + $0x8] sm:$0xff] %v311_v37 }
 0x28d   :  { %320 = vsyncpa [#allocation3], 1 }
 0x28e   :  { %321 = vsyncpa [#allocation5], 1 }

</bundles_post_ra>
